<compile_context>
chip_gen: v5e
topology: v5e:2x2
jax: 0.10.0
libtpu: 0.0.40
codegen_flags: <defaults>
</compile_context>

<pallas_src>
import jax
import jax.numpy as jnp
from jax.experimental import pallas as pl
from jax.experimental.pallas import tpu as pltpu


def _round_up(x, m):
    return (x + m - 1) // m * m


def _classifier_head_kernel(x_ref, w_ref, b_ref, o_ref, acc_ref):
    """One (tm, tn) output tile; K-reduction over grid axis 2 with f32 acc."""
    k = pl.program_id(2)

    @pl.when(k == 0)
    def _():
        acc_ref[...] = jnp.zeros_like(acc_ref)

    # Hot path: MXU matmul with f32 accumulation (operand dtype passes through:
    # feed bf16 x/W on v6e/v7x for ~2x MXU throughput, accumulate stays f32).
    acc_ref[...] += jnp.dot(
        x_ref[...], w_ref[...], preferred_element_type=jnp.float32
    )

    @pl.when(k == pl.num_programs(2) - 1)
    def _():
        # Fused bias add (broadcast (1, tn) over rows) + single lane-dense store.
        o_ref[...] = (acc_ref[...] + b_ref[...].astype(jnp.float32)).astype(
            o_ref.dtype
        )


def classifier_forward(x, w, b, *, tm_max=128, tn_max=256, tk_max=512):
    """logits = x @ w + b in a tiled Pallas TPU kernel.

    x: (B, H)  w: (H, C)  b: (1, C)  ->  (B, C)
    """
    B, H = x.shape
    H2, C = w.shape
    assert H == H2 and b.shape == (1, C)

    # --- tile sizes: sublane/lane aligned, capped for a VMEM-safe budget ---
    tm = min(tm_max, _round_up(B, 8))      # multiple of 8 (sublane)
    tn = min(tn_max, _round_up(C, 128))    # multiple of 128 (lane-dense output)
    tk = min(tk_max, _round_up(H, 128))    # multiple of 128 (lane axis of x)

    # --- zero-pad so every grid block is full (padding is layout plumbing) ---
    Bp, Cp, Hp = _round_up(B, tm), _round_up(C, tn), _round_up(H, tk)
    xp = jnp.pad(x, ((0, Bp - B), (0, Hp - H))) if (Bp != B or Hp != H) else x
    wp = jnp.pad(w, ((0, Hp - H), (0, Cp - C))) if (Hp != H or Cp != C) else w
    bp = jnp.pad(b, ((0, 0), (0, Cp - C))) if Cp != C else b

    grid = (Bp // tm, Cp // tn, Hp // tk)   # reduction axis (K) last

    out_bytes = Bp * Cp * jnp.dtype(x.dtype).itemsize
    cost = pl.CostEstimate(
        flops=2 * Bp * Hp * Cp,
        transcendentals=0,
        bytes_accessed=int(xp.nbytes) + int(wp.nbytes) + int(bp.nbytes) + out_bytes,
    )

    out = pl.pallas_call(
        _classifier_head_kernel,
        out_shape=jax.ShapeDtypeStruct((Bp, Cp), x.dtype),
        grid_spec=pltpu.PrefetchScalarGridSpec(
            num_scalar_prefetch=0,
            grid=grid,
            in_specs=[
                pl.BlockSpec((tm, tk), lambda i, j, k: (i, k)),   # x tile
                pl.BlockSpec((tk, tn), lambda i, j, k: (k, j)),   # W tile
                pl.BlockSpec((1, tn), lambda i, j, k: (0, j)),    # bias tile
            ],
            out_specs=pl.BlockSpec((tm, tn), lambda i, j, k: (i, j)),
            scratch_shapes=[pltpu.VMEM((tm, tn), jnp.float32)],   # f32 accumulator
        ),
        compiler_params=pltpu.CompilerParams(
            dimension_semantics=("parallel", "parallel", "arbitrary"),
        ),
        cost_estimate=cost,
    )(xp, wp, bp)

    # Strip the lane/sublane padding outside the kernel.
    return out[:B, :C]


if __name__ == "__main__":
    # Deterministic synthetic parameters / inputs (no checkpoint loading).
    # Shapes kept small but chosen to exercise the real kernel paths:
    # C=80 -> padded to 128 (lane-dense), H=1024 -> two K-reduction steps.
    key = jax.random.PRNGKey(0)
    k_x, k_w, k_b = jax.random.split(key, 3)

    batch, hidden, num_classes = 16, 1024, 80

    x = jax.random.normal(k_x, (batch, hidden), dtype=jnp.float32)
    w = jax.random.normal(k_w, (hidden, num_classes), dtype=jnp.float32) * 0.02
    b = jax.random.normal(k_b, (1, num_classes), dtype=jnp.float32) * 0.01

    logits = classifier_forward(x, w, b)
    logits = jax.block_until_ready(logits)

    # Sanity-check against pure-JAX reference.
    ref = x @ w + b
    assert logits.shape == (batch, num_classes)
    assert jnp.allclose(logits, ref, atol=1e-3, rtol=1e-3)

    print("KERNEL_OK")
</pallas_src>

<mosaic_0001>
module attributes {stable_mosaic.version = 11 : i64} {
  func.func @_classifier_head_kernel(%arg0: i32, %arg1: i32, %arg2: i32, %arg3: memref<16x512xf32, #tpu.memory_space<vmem>>, %arg4: memref<512x128xf32, #tpu.memory_space<vmem>>, %arg5: memref<1x128xf32, #tpu.memory_space<vmem>>, %arg6: memref<16x128xf32, #tpu.memory_space<vmem>>, %arg7: memref<16x128xf32, #tpu.memory_space<vmem>>) attributes {dimension_semantics = [#tpu.dimension_semantics<parallel>, #tpu.dimension_semantics<parallel>, #tpu.dimension_semantics<arbitrary>], iteration_bounds = array<i64: 1, 1, 2>, scalar_prefetch = 0 : i64, scratch_operands = 1 : i64, tpu.core_type = #tpu.core_type<tc>, window_params = [{transform_indices = @transform_0, window_bounds = array<i64: 16, 512>}, {transform_indices = @transform_1, window_bounds = array<i64: 512, 128>}, {transform_indices = @transform_2, window_bounds = array<i64: 1, 128>}, {transform_indices = @transform_3, window_bounds = array<i64: 16, 128>}]} {
    %c0_i32 = arith.constant 0 : i32
    %0 = arith.cmpi eq, %arg2, %c0_i32 : i32
    %1 = arith.extui %0 : i1 to i32
    %c0_i32_0 = arith.constant 0 : i32
    %2 = arith.cmpi ne, %1, %c0_i32_0 : i32
    scf.if %2 {
      %cst_9 = arith.constant 0.000000e+00 : f32
      %12 = vector.broadcast %cst_9 : f32 to vector<16x128xf32>
      %c0_10 = arith.constant 0 : index
      %c0_11 = arith.constant 0 : index
      %13 = vector.load %arg7[%c0_10, %c0_11] : memref<16x128xf32, #tpu.memory_space<vmem>>, vector<16x128xf32>
      tpu.vector_store %arg7[%c0_10, %c0_11], %12 {strides = array<i32>} : memref<16x128xf32, #tpu.memory_space<vmem>>, vector<16x128xf32>,
    } else {
    }
    %c0 = arith.constant 0 : index
    %c0_1 = arith.constant 0 : index
    %3 = vector.load %arg7[%c0, %c0_1] : memref<16x128xf32, #tpu.memory_space<vmem>>, vector<16x128xf32>
    %c0_2 = arith.constant 0 : index
    %c0_3 = arith.constant 0 : index
    %4 = vector.load %arg3[%c0_2, %c0_3] : memref<16x512xf32, #tpu.memory_space<vmem>>, vector<16x512xf32>
    %c0_4 = arith.constant 0 : index
    %c0_5 = arith.constant 0 : index
    %5 = vector.load %arg4[%c0_4, %c0_5] : memref<512x128xf32, #tpu.memory_space<vmem>>, vector<512x128xf32>
    %cst = arith.constant dense<0.000000e+00> : vector<16x128xf32>
    %6 = tpu.matmul %4, %5, %cst {dimension_numbers = #tpu.dot_dimension_numbers<[1], [0], [0], [1], [0, 0, 1, 1], [], []>} : vector<16x512xf32>, vector<512x128xf32>, vector<16x128xf32> -> vector<16x128xf32>
    %7 = arith.addf %3, %6 : vector<16x128xf32>
    %c0_6 = arith.constant 0 : index
    %c0_7 = arith.constant 0 : index
    %8 = vector.load %arg7[%c0_6, %c0_7] : memref<16x128xf32, #tpu.memory_space<vmem>>, vector<16x128xf32>
    tpu.vector_store %arg7[%c0_6, %c0_7], %7 {strides = array<i32>} : memref<16x128xf32, #tpu.memory_space<vmem>>, vector<16x128xf32>,
    %c1_i32 = arith.constant 1 : i32
    %9 = arith.cmpi eq, %arg2, %c1_i32 : i32
    %10 = arith.extui %9 : i1 to i32
    %c0_i32_8 = arith.constant 0 : i32
    %11 = arith.cmpi ne, %10, %c0_i32_8 : i32
    scf.if %11 {
      %c0_9 = arith.constant 0 : index
      %c0_10 = arith.constant 0 : index
      %12 = vector.load %arg7[%c0_9, %c0_10] : memref<16x128xf32, #tpu.memory_space<vmem>>, vector<16x128xf32>
      %c0_11 = arith.constant 0 : index
      %c0_12 = arith.constant 0 : index
      %13 = vector.load %arg5[%c0_11, %c0_12] : memref<1x128xf32, #tpu.memory_space<vmem>>, vector<1x128xf32>
      %14 = vector.broadcast %13 : vector<1x128xf32> to vector<16x128xf32>
      %15 = arith.addf %12, %14 : vector<16x128xf32>
      %c0_13 = arith.constant 0 : index
      %c0_14 = arith.constant 0 : index
      %16 = vector.load %arg6[%c0_13, %c0_14] : memref<16x128xf32, #tpu.memory_space<vmem>>, vector<16x128xf32>
      tpu.vector_store %arg6[%c0_13, %c0_14], %15 {strides = array<i32>} : memref<16x128xf32, #tpu.memory_space<vmem>>, vector<16x128xf32>,
    } else {
    }
    return
  }
  func.func @transform_0(%arg0: i32, %arg1: i32, %arg2: i32) -> (i32, i32) {
    %c0_i32 = arith.constant 0 : i32
    return %arg0, %arg2 : i32, i32
  }
  func.func @transform_1(%arg0: i32, %arg1: i32, %arg2: i32) -> (i32, i32) {
    %c0_i32 = arith.constant 0 : i32
    return %arg2, %arg1 : i32, i32
  }
  func.func @transform_2(%arg0: i32, %arg1: i32, %arg2: i32) -> (i32, i32) {
    %c0_i32 = arith.constant 0 : i32
    %c0_i32_0 = arith.constant 0 : i32
    return %c0_i32, %arg1 : i32, i32
  }
  func.func @transform_3(%arg0: i32, %arg1: i32, %arg2: i32) -> (i32, i32) {
    %c0_i32 = arith.constant 0 : i32
    return %arg0, %arg1 : i32, i32
  }
}

</mosaic_0001>

<bundles_post_ra>
// kernel: tpu_custom_call.1
= control target key start
LH: loop header
LB: loop body
LE: loop exit
PB: predicated region body
PF: predicated region fallthrough
CT: control target
= control target key end

     0   :  { %8 = vsyncpa [#allocation4], 0  ;;  %s1051_s0 = inlined_call_operand.hbm [shape: f32[16,1024], index: 0, kind: input, shape index: {}]   ;;  %s1052_s1 = inlined_call_operand.hbm [shape: f32[1024,128], index: 1, kind: input, shape index: {}]   ;;  %s1053_s2 = inlined_call_operand.vmem [shape: f32[1,128], index: 2, kind: input, shape index: {}]   ;;  %s1054_s3 = inlined_call_operand.hbm [shape: f32[16,128], index: 3, kind: output, shape index: {}]  }
   0x1   :  { %10 = vsyncpa [#allocation4 + $0x1], 0 }
   0x2   :  { %11 = vsyncpa [#allocation7], 0 }
   0x3   :  { %13 = vsyncpa [#allocation7 + $0x1], 0 }
   0x4   :  { %14 = vsyncpa [#allocation5], 0  ;;  %s858_s12 = smov 0   ;;  %s860_s13 = smov 0  }
   0x5   :  { %s862_s14 = smov 0   ;;  %s864_s15 = smov 0  }
   0x6   :  { %s866_s16 = smov 0   ;;  %s868_s17 = smov 0  }
   0x7 LB: > { %s1055_s18 = sadd.s32 4294967295, %s827_s17   ;;  %s32_s19 = sadd.s32 1, %s823_s16  ;;  %s827_s17 = sphi %s868_s17, %s20_s17   ;;  %s823_s16 = sphi %s866_s16, %s1064_s16   ;;  %s819_s15 = sphi %s864_s15, %s1063_s15   ;;  %s815_s14 = sphi %s862_s14, %s1062_s14   ;;  %s811_s13 = sphi %s860_s13, %s1061_s13   ;;  %s807_s12 = sphi %s858_s12, %s1060_s12  }
   0x8   : > { %p33_p0 = scmp.ge.s32.totalorder %s32_s19, 2  ;;  %s48_s20 = sadd.s32 1, %s815_s14 }
   0x9   : > { %p55_p1 = scmp.ne.s32.totalorder %s815_s14, %s811_s13  ;;  %p56_p2 = scmp.eq.s32.totalorder %s827_s17, 0 }
   0xa   : > { %s1066_s19 = smov (%p33_p0, %s32_s19), 0  ;;  %p61_p4 = scmp.ne.s32.totalorder %s811_s13, %s807_s12 }
   0xb   : > { %p894_p3 = por %p56_p2, %p55_p1  ;;  %s44_s22 = ssub.s32 %s823_s16, %s1066_s19 }
   0xc   : > { %p62_p5 = scmp.eq.s32.totalorder %s1055_s18, 0  ;;  %p46_p6 = scmp.eq.s32.totalorder %s44_s22, 0 }
   0xd   : > { %p620_p8 = scmp.lt.s32.totalorder %s827_s17, 2  ;;  %s912_s25 = sand.u32 1, %s815_s14  }
   0xe   : > { %p903_p7 = por %p62_p5, %p61_p4  ;;  %s603_s26 = sshll.u32 %s823_s16, 5 }
   0xf   : > { %s909_s24 = scalar_select %p46_p6, %s815_s14, %s48_s20  }
  0x10   : > { %s588_s27 = sshll.u32 %s912_s25, 6  ;;  %s185_s30 = scalar_lea.hbm %s1051_s0, %s603_s26 }
  0x11   : > { %s186_s4 = sshll.u32 %s185_s30, 4  ;;  %s177_s5 = scalar_lea.vmem [#allocation3], %s588_s27  ;;  %s187_s4 = int_to_ptr.hbm [resolvable:$true] %s186_s4 }
  0x12   : > { %s188_s6 = sshll.u32 %s177_s5, 4  ;;  %p921_p9 = pnand %p620_p8, %p894_p3  ;;  %s189_s6 = int_to_ptr.vmem [resolvable:$true] %s188_s6 }
  0x13   : > { %p594_p10 = scmp.ge.s32.totalorder %s827_s17, 1  ;;  %s174_s8 = scalar_lea.sflag [#allocation4], %s912_s25 }
  0x14   : > { %s829_s9 = smov 1024   ;;  %s830_s10 = smov 512  }
  0x15   : > { %s831_s11 = smov 32   ;;  %p219_p11 = scmp.lt.s32.totalorder %s827_s17, 3 }
  0x16   : > { %616 = dma.hbm_to_vmem [thread:$0]  (!%p921_p9), %s187_s4, 1024, %s189_s6, %s174_s8, %s829_s9, %s830_s10, %s831_s11  }
  0x17   : > { %s591_s12 = sshll.u32 %s912_s25, 9  ;;  %s604_s20 = sshll.u32 %s823_s16, 9 }
  0x18   : > { %p220_p12 = pnand %p594_p10, %p219_p11  ;;  %s208_s26 = scalar_lea.hbm %s1052_s1, %s604_s20 }
  0x19   : > { %s202_s27 = scalar_lea.vmem [#allocation6], %s591_s12  ;;  %s209_s29 = sshll.u32 %s208_s26, 4  ;;  %s210_s29 = int_to_ptr.hbm [resolvable:$true] %s209_s29 }
  0x1a   : > { %s211_s28 = sshll.u32 %s202_s27, 4  ;;  %s199_s30 = scalar_lea.sflag [#allocation7], %s912_s25  ;;  %s212_s28 = int_to_ptr.vmem [resolvable:$true] %s211_s28 }
  0x1b   : > { %s832_s5 = smov 128   ;;  %s833_s18 = smov 8  }
  0x1c   : > { %619 = dma.hbm_to_vmem [thread:$0]  (!%p921_p9), %s210_s29, 8192, %s212_s28, %s199_s30, %s832_s5, %s832_s5, %s833_s18  }
  0x1d   : > { %223 = sbr.rel (%p220_p12) target bundleno = 245 (0xf5), region = 32  ;;  %s225_s4 = sand.u32 (!%p220_p12), 1, %s811_s13  }
  0x1e   : > { %s595_s6 = sshll.u32 (!%p220_p12), %s225_s4, 6  ;;  %s226_s8 = scalar_lea.sflag (!%p220_p12), [#allocation4], %s225_s4 }
  0x1f   : > { %s939_s9 = scalar_lea.vmem (!%p220_p12), [#allocation3], %s595_s6 }
  0x22   : > { %794 = dma.done.wait (%p903_p7), %s226_s8, 1024  }
  0x23   : > { %796 = vsyncadd (%p903_p7), %s226_s8, 4294966272  ;;  %s596_s10 = sshll.u32 %s225_s4, 9  ;;  %s236_s25 = scalar_lea.sflag [#allocation7], %s225_s4 }
  0x24   : > { %s945_s11 = scalar_lea.vmem [#allocation6], %s596_s10 }
  0x25   : > { %798 = dma.done.wait (%p903_p7), %s236_s25, 8192  }
  0x26   : > { %800 = vsyncadd (%p903_p7), %s236_s25, 4294959104  ;;  %p597_p13 = scmp.ne.s32.totalorder %s819_s15, 0 }
  0x28   : > { %276 = sbr.rel (%p597_p13) target bundleno = 48 (0x30), region = 44 }
  0x2d   : > { %v834_v0 = vmov 0.0  }
  0x2e   : > { %277 = vst [vmem:[#allocation2] sm:$0xff] %v834_v0 }
  0x2f   : > { %278 = vst [vmem:[#allocation2 + $0x8] sm:$0xff] %v834_v0 }
  0x30 PF: > { %v336_v1 = vld [vmem:[%s945_s11 + $0x178] sm:$0xff]  ;;  %v335_v2 = vld [vmem:[%s945_s11 + $0x170] sm:$0xff]  ;;  %v334_v6 = vld [vmem:[%s945_s11 + $0x168] sm:$0xff]  ;;  %p598_p0 = scmp.ne.s32.totalorder %s819_s15, 1 }
  0x31   : > { %v352_v3 = vld [vmem:[%s945_s11 + $0x1f8] sm:$0xff]  ;;  %399 = vmatpush.msra.mxu2 %v336_v1  ;;  %v351_v7 = vld [vmem:[%s945_s11 + $0x1f0] sm:$0xff]  ;;  %v350_v10 = vld [vmem:[%s945_s11 + $0x1e8] sm:$0xff] }
  0x32   : > { %422 = vmatpush.msra.mxu3 %v352_v3  ;;  %v304_v4 = vld [vmem:[%s945_s11 + $0x78] sm:$0xff]  ;;  %v303_v8 = vld [vmem:[%s945_s11 + $0x70] sm:$0xff]  ;;  %v302_v11 = vld [vmem:[%s945_s11 + $0x68] sm:$0xff] }
  0x33   : > { %v320_v5 = vld [vmem:[%s945_s11 + $0xf8] sm:$0xff]  ;;  %353 = vmatpush.msra.mxu0 %v304_v4  ;;  %v319_v9 = vld [vmem:[%s945_s11 + $0xf0] sm:$0xff]  ;;  %400 = vmatpush.msra.mxu2 %v335_v2  ;;  %v333_v12 = vld [vmem:[%s945_s11 + $0x160] sm:$0xff] }
  0x34   : > { %376 = vmatpush.msra.mxu1 %v320_v5  ;;  %423 = vmatpush.msra.mxu3 %v351_v7  ;;  %v318_v13 = vld [vmem:[%s945_s11 + $0xe8] sm:$0xff]  ;;  %v349_v14 = vld [vmem:[%s945_s11 + $0x1e0] sm:$0xff]  ;;  %v332_v17 = vld [vmem:[%s945_s11 + $0x158] sm:$0xff] }
  0x35   : > { %354 = vmatpush.msra.mxu0 %v303_v8  ;;  %401 = vmatpush.msra.mxu2 %v334_v6  ;;  %v301_v15 = vld [vmem:[%s945_s11 + $0x60] sm:$0xff]  ;;  %v348_v18 = vld [vmem:[%s945_s11 + $0x1d8] sm:$0xff]  ;;  %v331_v21 = vld [vmem:[%s945_s11 + $0x150] sm:$0xff] }
  0x36   : > { %377 = vmatpush.msra.mxu1 %v319_v9  ;;  %424 = vmatpush.msra.mxu3 %v350_v10  ;;  %v317_v16 = vld [vmem:[%s945_s11 + $0xe0] sm:$0xff]  ;;  %v300_v19 = vld [vmem:[%s945_s11 + $0x58] sm:$0xff]  ;;  %v347_v22 = vld [vmem:[%s945_s11 + $0x1d0] sm:$0xff] }
  0x37   : > { %355 = vmatpush.msra.mxu0 %v302_v11  ;;  %402 = vmatpush.msra.mxu2 %v333_v12  ;;  %v316_v20 = vld [vmem:[%s945_s11 + $0xd8] sm:$0xff]  ;;  %v299_v23 = vld [vmem:[%s945_s11 + $0x50] sm:$0xff]  ;;  %v330_v25 = vld [vmem:[%s945_s11 + $0x148] sm:$0xff] }
  0x38   : > { %378 = vmatpush.msra.mxu1 %v318_v13  ;;  %425 = vmatpush.msra.mxu3 %v349_v14  ;;  %v315_v24 = vld [vmem:[%s945_s11 + $0xd0] sm:$0xff]  ;;  %v346_v26 = vld [vmem:[%s945_s11 + $0x1c8] sm:$0xff]  ;;  %v329_v29 = vld [vmem:[%s945_s11 + $0x140] sm:$0xff] }
  0x39   : > { %356 = vmatpush.msra.mxu0 %v301_v15  ;;  %403 = vmatpush.msra.mxu2 %v332_v17  ;;  %v298_v27 = vld [vmem:[%s945_s11 + $0x48] sm:$0xff]  ;;  %v345_v30 = vld [vmem:[%s945_s11 + $0x1c0] sm:$0xff]  ;;  %v328_v33 = vld [vmem:[%s945_s11 + $0x138] sm:$0xff] }
  0x3a   : > { %379 = vmatpush.msra.mxu1 %v317_v16  ;;  %426 = vmatpush.msra.mxu3 %v348_v18  ;;  %v314_v28 = vld [vmem:[%s945_s11 + $0xc8] sm:$0xff]  ;;  %v297_v31 = vld [vmem:[%s945_s11 + $0x40] sm:$0xff]  ;;  %v344_v34 = vld [vmem:[%s945_s11 + $0x1b8] sm:$0xff] }
  0x3b   : > { %357 = vmatpush.msra.mxu0 %v300_v19  ;;  %404 = vmatpush.msra.mxu2 %v331_v21  ;;  %v313_v32 = vld [vmem:[%s945_s11 + $0xc0] sm:$0xff]  ;;  %v296_v35 = vld [vmem:[%s945_s11 + $0x38] sm:$0xff]  ;;  %v327_v37 = vld [vmem:[%s945_s11 + $0x130] sm:$0xff] }
  0x3c   : > { %380 = vmatpush.msra.mxu1 %v316_v20  ;;  %427 = vmatpush.msra.mxu3 %v347_v22  ;;  %v312_v36 = vld [vmem:[%s945_s11 + $0xb8] sm:$0xff]  ;;  %v343_v38 = vld [vmem:[%s945_s11 + $0x1b0] sm:$0xff]  ;;  %v326_v41 = vld [vmem:[%s945_s11 + $0x128] sm:$0xff] }
  0x3d   : > { %358 = vmatpush.msra.mxu0 %v299_v23  ;;  %405 = vmatpush.msra.mxu2 %v330_v25  ;;  %v295_v39 = vld [vmem:[%s945_s11 + $0x30] sm:$0xff]  ;;  %v342_v42 = vld [vmem:[%s945_s11 + $0x1a8] sm:$0xff]  ;;  %v325_v45 = vld [vmem:[%s945_s11 + $0x120] sm:$0xff] }
  0x3e   : > { %381 = vmatpush.msra.mxu1 %v315_v24  ;;  %428 = vmatpush.msra.mxu3 %v346_v26  ;;  %v311_v40 = vld [vmem:[%s945_s11 + $0xb0] sm:$0xff]  ;;  %v294_v43 = vld [vmem:[%s945_s11 + $0x28] sm:$0xff]  ;;  %v341_v46 = vld [vmem:[%s945_s11 + $0x1a0] sm:$0xff] }
  0x3f   : > { %359 = vmatpush.msra.mxu0 %v298_v27  ;;  %406 = vmatpush.msra.mxu2 %v329_v29  ;;  %v310_v44 = vld [vmem:[%s945_s11 + $0xa8] sm:$0xff]  ;;  %v293_v47 = vld [vmem:[%s945_s11 + $0x20] sm:$0xff]  ;;  %v324_v49 = vld [vmem:[%s945_s11 + $0x118] sm:$0xff] }
  0x40   : > { %382 = vmatpush.msra.mxu1 %v314_v28  ;;  %429 = vmatpush.msra.mxu3 %v345_v30  ;;  %v309_v48 = vld [vmem:[%s945_s11 + $0xa0] sm:$0xff]  ;;  %v340_v50 = vld [vmem:[%s945_s11 + $0x198] sm:$0xff]  ;;  %v323_v53 = vld [vmem:[%s945_s11 + $0x110] sm:$0xff] }
  0x41   : > { %360 = vmatpush.msra.mxu0 %v297_v31  ;;  %407 = vmatpush.msra.mxu2 %v328_v33  ;;  %v292_v51 = vld [vmem:[%s945_s11 + $0x18] sm:$0xff]  ;;  %v339_v54 = vld [vmem:[%s945_s11 + $0x190] sm:$0xff]  ;;  %v322_v57 = vld [vmem:[%s945_s11 + $0x108] sm:$0xff] }
  0x42   : > { %383 = vmatpush.msra.mxu1 %v313_v32  ;;  %430 = vmatpush.msra.mxu3 %v344_v34  ;;  %v308_v52 = vld [vmem:[%s945_s11 + $0x98] sm:$0xff]  ;;  %v291_v55 = vld [vmem:[%s945_s11 + $0x10] sm:$0xff]  ;;  %v338_v58 = vld [vmem:[%s945_s11 + $0x188] sm:$0xff] }
  0x43   : > { %361 = vmatpush.msra.mxu0 %v296_v35  ;;  %408 = vmatpush.msra.mxu2 %v327_v37  ;;  %v307_v56 = vld [vmem:[%s945_s11 + $0x90] sm:$0xff]  ;;  %v290_v59 = vld [vmem:[%s945_s11 + $0x8] sm:$0xff]  ;;  %v321_v61 = vld [vmem:[%s945_s11 + $0x100] sm:$0xff] }
  0x44   : > { %384 = vmatpush.msra.mxu1 %v312_v36  ;;  %431 = vmatpush.msra.mxu3 %v343_v38  ;;  %v306_v60 = vld [vmem:[%s945_s11 + $0x88] sm:$0xff]  ;;  %v337_v62 = vld [vmem:[%s945_s11 + $0x180] sm:$0xff]  ;;  %v283_v63 = vld [vmem:[%s939_s9 + $0x10] sm:$0xff] }
  0x45   : > { %362 = vmatpush.msra.mxu0 %v295_v39  ;;  %409 = vmatpush.msra.mxu2 %v326_v41  ;;  %v284_v0 = vld [vmem:[%s939_s9 + $0x18] sm:$0xff]  ;;  %v289_v1 = vld [vmem:[%s945_s11] sm:$0xff]  ;;  %v282_v4 = vld [vmem:[%s939_s9 + $0x8] sm:$0xff] }
  0x46   : > { %385 = vmatpush.msra.mxu1 %v311_v40  ;;  %432 = vmatpush.msra.mxu3 %v342_v42  ;;  %v305_v2 = vld [vmem:[%s945_s11 + $0x80] sm:$0xff]  ;;  %v287_v5 = vld [vmem:[%s939_s9 + $0x30] sm:$0xff]  ;;  %v288_v6 = vld [vmem:[%s939_s9 + $0x38] sm:$0xff] }
  0x47   : > { %363 = vmatpush.msra.mxu0 %v294_v43  ;;  %410 = vmatpush.msra.mxu2 %v325_v45  ;;  %v281_v3 = vld [vmem:[%s939_s9] sm:$0xff]  ;;  %v286_v8 = vld [vmem:[%s939_s9 + $0x28] sm:$0xff]  ;;  %v279_v15 = vld [vmem:[#allocation2] sm:$0xff] }
  0x48   : > { %386 = vmatpush.msra.mxu1 %v310_v44  ;;  %433 = vmatpush.msra.mxu3 %v341_v46  ;;  %v285_v7 = vld [vmem:[%s939_s9 + $0x20] sm:$0xff]  ;;  %v280_v24 = vld [vmem:[#allocation2 + $0x8] sm:$0xff] }
  0x49   : > { %364 = vmatpush.msra.mxu0 %v293_v47  ;;  %411 = vmatpush.msra.mxu2 %v324_v49 }
  0x4a   : > { %387 = vmatpush.msra.mxu1 %v309_v48  ;;  %434 = vmatpush.msra.mxu3 %v340_v50 }
  0x4b   : > { %365 = vmatpush.msra.mxu0 %v292_v51  ;;  %412 = vmatpush.msra.mxu2 %v323_v53 }
  0x4c   : > { %388 = vmatpush.msra.mxu1 %v308_v52  ;;  %435 = vmatpush.msra.mxu3 %v339_v54 }
  0x4d   : > { %366 = vmatpush.msra.mxu0 %v291_v55  ;;  %413 = vmatpush.msra.mxu2 %v322_v57 }
  0x4e   : > { %389 = vmatpush.msra.mxu1 %v307_v56  ;;  %436 = vmatpush.msra.mxu3 %v338_v58 }
  0x4f   : > { %367 = vmatpush.msra.mxu0 %v290_v59  ;;  %414 = vmatpush.msra.mxu2 %v321_v61 }
  0x50   : > { %390 = vmatpush.msra.mxu1 %v306_v60  ;;  %437 = vmatpush.msra.mxu3 %v337_v62 }
  0x51   : > { %415 = vmatmul.f32.vlgmr.msra.gmra.mxu2 %v283_v63  ;;  %438 = vmatmul.f32.vlgmr.msra.gmra.mxu3 %v284_v0 }
  0x52   : > { %368 = vmatpush.msra.mxu0 %v289_v1  ;;  %391 = vmatpush.msra.mxu1 %v305_v2 }
  0x53   : > { %369 = vmatmul.f32.vlgmr.msra.gmra.mxu0 %v281_v3  ;;  %392 = vmatmul.f32.vlgmr.msra.gmra.mxu1 %v282_v4 }
  0x59   : > { %418 = vmatmul.f32.gmra.mxu2 %v287_v5  ;;  %441 = vmatmul.f32.gmra.mxu3 %v288_v6 }
  0x5b   : > { %372 = vmatmul.f32.gmra.mxu0 %v285_v7  ;;  %395 = vmatmul.f32.gmra.mxu1 %v286_v8 }
  0xd0   : > { %v370_v9 = vpop.f32.mrf.mxu0  ;;  %v393_v10 = vpop.f32.mrf.mxu1 }
  0xd1   : > { %v394_v11 = vadd.f32 %v393_v10, %v370_v9 }
  0xd4   : > { %v416_v12 = vpop.f32.mrf.mxu2  ;;  %v439_v13 = vpop.f32.mrf.mxu3 }
  0xd5   : > { %v417_v14 = vadd.f32 %v416_v12, %v394_v11 }
  0xd7   : > { %v440_v16 = vadd.f32 %v439_v13, %v417_v14 }
  0xd8   : > { %v373_v17 = vpop.f32.mrf.mxu0  ;;  %v396_v18 = vpop.f32.mrf.mxu1 }
  0xd9   : > { %v445_v19 = vadd.f32 %v440_v16, %v279_v15  ;;  %v397_v20 = vadd.f32 %v396_v18, %v373_v17 }
  0xdb   : > { %447 = vst [vmem:[#allocation2] sm:$0xff] %v445_v19 }
  0xdc   : > { %v419_v21 = vpop.f32.mrf.mxu2  ;;  %v442_v22 = vpop.f32.mrf.mxu3 }
  0xdd   : > { %v420_v23 = vadd.f32 %v419_v21, %v397_v20 }
  0xdf   : > { %v443_v25 = vadd.f32 %v442_v22, %v420_v23  ;;  %452 = sbr.rel (%p598_p0) target bundleno = 238 (0xee), region = 48 }
  0xe1   : > { %v446_v26 = vadd.f32 %v443_v25, %v280_v24 }
  0xe3   : > { %448 = vst [vmem:[#allocation2 + $0x8] sm:$0xff] %v446_v26 }
  0xe4   : > { %v453_v27 = vld [vmem:[#allocation2] sm:$0xff] }
  0xe5   : > { %v680_v28 = vld [vmem:[%s1053_s2] ss:$0 sm:$0xff] }
  0xe6   : > { %v459_v30 = vadd.f32 %v680_v28, %v453_v27 }
  0xe8   : > { %461 = vst [vmem:[#allocation8] sm:$0xff] %v459_v30 }
  0xea   : > { %v454_v29 = vld [vmem:[#allocation2 + $0x8] sm:$0xff] }
  0xeb   : > { %v460_v31 = vadd.f32 %v680_v28, %v454_v29 }
  0xed   : > { %462 = vst [vmem:[#allocation8 + $0x8] sm:$0xff] %v460_v31 }
  0xee PF: > { %s1059_s7 = sadd.s32 4294967295, %s827_s17   ;;  %s474_s22 = sshll.u32 %s1054_s3, 4  ;;  %s475_s22 = int_to_ptr.hbm [resolvable:$true] %s474_s22 }
  0xef   : > { %p621_p1 = scmp.eq.s32.totalorder %s1059_s7, 1  ;;  %s835_s15 = smov [#allocation8]  }
  0xf0   : > { %s472_s21 = sshll.u32 %s835_s15, 4  ;;  %s836_s26 = smov 128   ;;  %s473_s21 = int_to_ptr.vmem [resolvable:$true] %s472_s21 }
  0xf1   : > { %s837_s27 = smov 8  }
  0xf2   : > { %610 = dma.vmem_to_hbm [thread:$0]  (%p621_p1), %s473_s21, 256, %s475_s22, [#allocation5], %s836_s26, %s836_s26, %s837_s27  }
  0xf3   : > { %802 = dma.done.wait (%p621_p1), [#allocation5], 256  }
  0xf4   : > { %804 = vsyncadd (%p621_p1), [#allocation5], 4294967040 }
  0xf5 PF: > { %s20_s17 = sadd.s32 1, %s827_s17   ;;  %s1060_s12 = smov %s811_s13 }
  0xf6   : > { %p17_p2 = scmp.ge.s32.totalorder %s20_s17, 4   ;;  %s1061_s13 = smov %s815_s14 }
  0xf7   : > { %s1062_s14 = smov %s909_s24  ;;  %s1063_s15 = smov %s823_s16 }
  0xf8   : > { %s1064_s16 = smov %s1066_s19  ;;  %19 = sbr.rel (!%p17_p2) target bundleno = 7 (0x7), region = 94 }
  0xfd   :  { %491 = vsyncpa [#allocation4], 1 }
  0xfe   :  { %493 = vsyncpa [#allocation4 + $0x1], 1 }
  0xff   :  { %494 = vsyncpa [#allocation7], 1 }
 0x100   :  { %496 = vsyncpa [#allocation7 + $0x1], 1 }
 0x101   :  { %497 = vsyncpa [#allocation5], 1 }
 0x102   :  { %499 = vsyncpa [#allocation5 + $0x1], 1 }

</bundles_post_ra>
